<compile_context>
chip_gen: v5e
topology: v5e:2x2
jax: 0.10.0
libtpu: 0.0.40
codegen_flags: <defaults>
</compile_context>

<pallas_src>
import functools
import math

import jax
import jax.numpy as jnp
from jax.experimental import pallas as pl
from jax.experimental.pallas import tpu as pltpu


_MASKED_SCORE = -30.0  # finite stand-in for torch.finfo(float32).min; sigmoid(-30) ~ 9.4e-14


def _round_up(n: int, m: int) -> int:
    return ((n + m - 1) // m) * m


def _cdiv(a: int, b: int) -> int:
    return -(-a // b)


def _vadscale_kernel(x_ref, wmix_ref, wvad_ref, bias_ref, *rest, has_mask):
    # x_ref:    (D, L, Tt)  activation tile (batch dim squeezed), input dtype
    # wmix_ref: (L, L, 1)   wmix_ref[k, l, 0] = softmax(score_vec_l)[k]    (f32)
    # wvad_ref: (D, L, 1)   wvad_ref[d, l, 0] = vad_weight[l, d, 0]        (f32)
    # bias_ref: (L, 1)                                                      (f32)
    # mask_ref: (1, Tt)     only when has_mask; 1.0 = keep, 0.0 = masked
    # o_ref:    (D, L, Tt)  output tile, input dtype
    if has_mask:
        mask_ref, o_ref = rest
    else:
        (o_ref,) = rest

    x = x_ref[...].astype(jnp.float32)             # (D, L, Tt)  f32 compute
    wm = wmix_ref[...]                             # (L, L, 1)
    wv = wvad_ref[...]                             # (D, L, 1)
    b3 = bias_ref[...][None, :, :]                 # (1, L, 1)
    D, L, Tt = x.shape

    # 1) SUPERB layer mix: y[d, l, t] = sum_k wm[k, l] * x[d, k, t]
    #    L is tiny so this is pure VPU FMAs (an MXU matmul would be ~1% utilized).
    y = x[:, 0:1, :] * wm[0:1]
    for k in range(1, L):
        y = y + x[:, k:k + 1, :] * wm[k:k + 1]

    # 2) VAD score: scr[l, t] = sum_d y[d, l, t] * wvad[d, l] + bias[l]
    #    Reduce over D in static chunks so no full (D, Lpad, Tt) product temp is live.
    dc = _round_up(max(8, _cdiv(D, 8)), 8)         # <= ~8 chunks, multiple of 8 sublane-groups
    scr = jnp.zeros((1, L, Tt), jnp.float32)
    for d0 in range(0, D, dc):
        scr = scr + jnp.sum(y[d0:d0 + dc] * wv[d0:d0 + dc], axis=0, keepdims=True)
    scr = scr + b3                                  # (1, L, Tt)

    # 3) mask -> sigmoid -> gate.  exp and reciprocal both sit on the EUP slot.
    if has_mask:
        keep = mask_ref[...] > 0.0                  # (1, Tt)
        scr = jnp.where(keep[:, None, :], scr, _MASKED_SCORE)
    s = pl.reciprocal(1.0 + jnp.exp(-scr), approx=False)   # full-precision rcp (accuracy)
    o_ref[...] = (y * s).astype(o_ref.dtype)


@functools.partial(jax.jit, static_argnames=("tile_t",))
def vadscale_forward(x, score_vectors, weight, bias, mask=None, *, tile_t=2048):
    """Fused VADscale forward.

    x:             (B, D, L, T)   any float dtype (bf16 stays bf16 on the wire)
    score_vectors: (L, L)         row i = superb[i].score_vector (softmax applied here)
    weight:        (L, D, 1)
    bias:          (L, 1, 1)
    mask:          (B, T) bool (or float) or None
    returns:       (B, D, L, T), same dtype as x
    """
    B, D, L, T = x.shape
    isize = x.dtype.itemsize

    # ---- tiny parameter prep (constant block index -> DMA'd once) ----
    wmix = jax.nn.softmax(score_vectors.astype(jnp.float32), axis=-1)     # (L, L), row l
    wmix_k = jnp.transpose(wmix).reshape(L, L, 1)                         # [k, l, 0]
    wvad = jnp.transpose(weight[:, :, 0]).reshape(D, L, 1).astype(jnp.float32)
    bias2 = bias.reshape(L, 1).astype(jnp.float32)

    # ---- T tiling: lane-dense 128-multiples, sized from a real VMEM footprint model ----
    lp = _round_up(L, 8)                      # sublane padding of the L axis
    dc = _round_up(max(8, _cdiv(D, 8)), 8)    # in-kernel reduction chunk
    per_t = (4 * D * lp * isize               # double-buffered x and out blocks
             + D * lp * 4                     # y (f32)
             + (D * lp * 4 if isize < 4 else 0)   # f32 upcast copy of x
             + dc * lp * 4                    # chunked scr product temp
             + 8 * lp * 4)                    # scr / sigmoid / misc small temps
    budget = 24 * 1024 * 1024                 # conservative across v5e / v6e / v7x
    tile = max(128, min(_round_up(tile_t, 128),
                        max(128, (budget // per_t) // 128 * 128)))
    if B == 1 and T > 128:                    # keep >= 2 parallel grid steps for megacore
        tile = min(tile, max(128, _round_up(_cdiv(T, 2), 128)))
    if T <= tile:
        tile = T                              # single full-width block (layout-legal)
    nt = _cdiv(T, tile)                       # ragged last block handled by Pallas
    params_pad = (D + 2 * L) * 8 * 128 * 4 * 2
    vmem_limit = int(min(48 * 2 ** 20, max(32 * 2 ** 20, 2 * per_t * tile + params_pad)))

    in_specs = [
        pl.BlockSpec((None, D, L, tile), lambda b, t: (b, 0, 0, t)),      # x tile
        pl.BlockSpec((L, L, 1), lambda b, t: (0, 0, 0)),                  # mix weights (resident)
        pl.BlockSpec((D, L, 1), lambda b, t: (0, 0, 0)),                  # vad weights (resident)
        pl.BlockSpec((L, 1), lambda b, t: (0, 0)),                        # vad bias (resident)
    ]
    operands = [x, wmix_k, wvad, bias2]
    if mask is not None:
        operands.append(mask.astype(jnp.float32).reshape(B, 1, T))
        in_specs.append(pl.BlockSpec((None, 1, tile), lambda b, t: (b, 0, t)))

    return pl.pallas_call(
        functools.partial(_vadscale_kernel, has_mask=mask is not None),
        out_shape=jax.ShapeDtypeStruct((B, D, L, T), x.dtype),
        grid=(B, nt),
        in_specs=in_specs,
        out_specs=pl.BlockSpec((None, D, L, tile), lambda b, t: (b, 0, 0, t)),
        compiler_params=pltpu.CompilerParams(
            dimension_semantics=("parallel", "parallel"),
            vmem_limit_bytes=vmem_limit),
    )(*operands)


def _reference(x, score_vectors, weight, bias, mask):
    # Pure-JAX mirror of VADscale.forward (torch semantics), computed in f32.
    xf = x.astype(jnp.float32)
    wmix = jax.nn.softmax(score_vectors.astype(jnp.float32), axis=-1)     # (L, L)
    y = jnp.einsum("lk,bdkt->bdlt", wmix, xf)                             # stacked SUPERB outputs
    scr = jnp.einsum("bdlt,ld->blt", y, weight[:, :, 0].astype(jnp.float32))
    scr = scr + bias[:, 0, 0].astype(jnp.float32)[None, :, None]
    if mask is not None:
        scr = jnp.where(mask[:, None, :], scr, jnp.finfo(jnp.float32).min)
    s = jax.nn.sigmoid(scr)                                               # (B, L, T)
    return y * s[:, None, :, :]


if __name__ == "__main__":
    key = jax.random.PRNGKey(0)
    k_x, k_w, k_b = jax.random.split(key, 3)

    # x: (B, D, L, T) -- T deliberately NOT a multiple of 128 to exercise the ragged tile
    B, D, L, T = 2, 32, 4, 200
    x = jax.random.normal(k_x, (B, D, L, T), dtype=jnp.float32)

    # Deterministic synthetic parameters matching the module's structure:
    score_vectors = jnp.eye(L, dtype=jnp.float32)          # SUPERB init: one-hot score per layer
    bound = math.sqrt(6.0 / (D + L))                       # xavier_uniform bound for (L, D, 1)
    weight = jax.random.uniform(k_w, (L, D, 1), jnp.float32, minval=-bound, maxval=bound)
    bias = jax.random.normal(k_b, (L, 1, 1), jnp.float32) * 0.1
    lengths = jnp.array([T, T - 37], dtype=jnp.int32)
    mask = jnp.arange(T, dtype=jnp.int32)[None, :] < lengths[:, None]     # (B, T) bool

    # 1) masked path with a ragged last T-tile (tile_t=128 -> 2 tiles, second partial)
    out = jax.block_until_ready(
        vadscale_forward(x, score_vectors, weight, bias, mask, tile_t=128))
    ref = _reference(x, score_vectors, weight, bias, mask)
    assert out.shape == (B, D, L, T)
    assert jnp.allclose(out, ref, atol=2e-5, rtol=2e-5), float(jnp.max(jnp.abs(out - ref)))

    # 2) mask=None variant (module default), single full-width tile
    out2 = jax.block_until_ready(vadscale_forward(x, score_vectors, weight, bias))
    ref2 = _reference(x, score_vectors, weight, bias, None)
    assert jnp.allclose(out2, ref2, atol=2e-5, rtol=2e-5), float(jnp.max(jnp.abs(out2 - ref2)))

    # 3) bf16 I/O on the wire (compute stays f32 in-kernel)
    xb = x.astype(jnp.bfloat16)
    out3 = jax.block_until_ready(vadscale_forward(xb, score_vectors, weight, bias, mask))
    ref3 = _reference(xb, score_vectors, weight, bias, mask)
    assert out3.dtype == jnp.bfloat16
    assert jnp.allclose(out3.astype(jnp.float32), ref3, atol=5e-2, rtol=5e-2), \
        float(jnp.max(jnp.abs(out3.astype(jnp.float32) - ref3)))

    print("KERNEL_OK")
</pallas_src>

<mosaic_0001>
module attributes {stable_mosaic.version = 11 : i64} {
  func.func @_vadscale_kernel(%arg0: i32, %arg1: i32, %arg2: memref<1x32x4x128xf32, #tpu.memory_space<vmem>>, %arg3: memref<4x4x1xf32, #tpu.memory_space<vmem>>, %arg4: memref<32x4x1xf32, #tpu.memory_space<vmem>>, %arg5: memref<4x1xf32, #tpu.memory_space<vmem>>, %arg6: memref<1x1x128xf32, #tpu.memory_space<vmem>>, %arg7: memref<1x32x4x128xf32, #tpu.memory_space<vmem>>) attributes {dimension_semantics = [#tpu.dimension_semantics<parallel>, #tpu.dimension_semantics<parallel>], iteration_bounds = array<i64: 2, 2>, scalar_prefetch = 0 : i64, scratch_operands = 0 : i64, tpu.core_type = #tpu.core_type<tc>, window_params = [{transform_indices = @transform_0, window_bounds = array<i64: 1, 32, 4, 128>}, {pipeline_mode = #tpu.pipeline_mode<synchronous>, transform_indices = @transform_1, window_bounds = array<i64: 4, 4, 1>}, {pipeline_mode = #tpu.pipeline_mode<synchronous>, transform_indices = @transform_2, window_bounds = array<i64: 32, 4, 1>}, {pipeline_mode = #tpu.pipeline_mode<synchronous>, transform_indices = @transform_3, window_bounds = array<i64: 4, 1>}, {transform_indices = @transform_4, window_bounds = array<i64: 1, 1, 128>}, {transform_indices = @transform_5, window_bounds = array<i64: 1, 32, 4, 128>}]} {
    %c0 = arith.constant 0 : index
    %c0_0 = arith.constant 0 : index
    %c0_1 = arith.constant 0 : index
    %c0_2 = arith.constant 0 : index
    %0 = vector.load %arg2[%c0, %c0_0, %c0_1, %c0_2] : memref<1x32x4x128xf32, #tpu.memory_space<vmem>>, vector<1x32x4x128xf32>
    %1 = vector.shape_cast %0 : vector<1x32x4x128xf32> to vector<32x4x128xf32>
    %c0_3 = arith.constant 0 : index
    %c0_4 = arith.constant 0 : index
    %c0_5 = arith.constant 0 : index
    %2 = vector.load %arg3[%c0_3, %c0_4, %c0_5] : memref<4x4x1xf32, #tpu.memory_space<vmem>>, vector<4x4x1xf32>
    %c0_6 = arith.constant 0 : index
    %c0_7 = arith.constant 0 : index
    %c0_8 = arith.constant 0 : index
    %3 = vector.load %arg4[%c0_6, %c0_7, %c0_8] : memref<32x4x1xf32, #tpu.memory_space<vmem>>, vector<32x4x1xf32>
    %c0_9 = arith.constant 0 : index
    %c0_10 = arith.constant 0 : index
    %4 = vector.load %arg5[%c0_9, %c0_10] : memref<4x1xf32, #tpu.memory_space<vmem>>, vector<4x1xf32>
    %5 = vector.shape_cast %4 : vector<4x1xf32> to vector<1x4x1xf32>
    %6 = vector.extract_strided_slice %1 {offsets = [0, 0, 0], sizes = [32, 1, 128], strides = [1, 1, 1]} : vector<32x4x128xf32> to vector<32x1x128xf32>
    %7 = vector.extract_strided_slice %2 {offsets = [0, 0, 0], sizes = [1, 4, 1], strides = [1, 1, 1]} : vector<4x4x1xf32> to vector<1x4x1xf32>
    %8 = vector.broadcast %6 : vector<32x1x128xf32> to vector<32x4x128xf32>
    %9 = vector.broadcast %7 : vector<1x4x1xf32> to vector<32x4x128xf32>
    %10 = arith.mulf %8, %9 : vector<32x4x128xf32>
    %11 = vector.extract_strided_slice %1 {offsets = [0, 1, 0], sizes = [32, 1, 128], strides = [1, 1, 1]} : vector<32x4x128xf32> to vector<32x1x128xf32>
    %12 = vector.extract_strided_slice %2 {offsets = [1, 0, 0], sizes = [1, 4, 1], strides = [1, 1, 1]} : vector<4x4x1xf32> to vector<1x4x1xf32>
    %13 = vector.broadcast %11 : vector<32x1x128xf32> to vector<32x4x128xf32>
    %14 = vector.broadcast %12 : vector<1x4x1xf32> to vector<32x4x128xf32>
    %15 = arith.mulf %13, %14 : vector<32x4x128xf32>
    %16 = arith.addf %10, %15 : vector<32x4x128xf32>
    %17 = vector.extract_strided_slice %1 {offsets = [0, 2, 0], sizes = [32, 1, 128], strides = [1, 1, 1]} : vector<32x4x128xf32> to vector<32x1x128xf32>
    %18 = vector.extract_strided_slice %2 {offsets = [2, 0, 0], sizes = [1, 4, 1], strides = [1, 1, 1]} : vector<4x4x1xf32> to vector<1x4x1xf32>
    %19 = vector.broadcast %17 : vector<32x1x128xf32> to vector<32x4x128xf32>
    %20 = vector.broadcast %18 : vector<1x4x1xf32> to vector<32x4x128xf32>
    %21 = arith.mulf %19, %20 : vector<32x4x128xf32>
    %22 = arith.addf %16, %21 : vector<32x4x128xf32>
    %23 = vector.extract_strided_slice %1 {offsets = [0, 3, 0], sizes = [32, 1, 128], strides = [1, 1, 1]} : vector<32x4x128xf32> to vector<32x1x128xf32>
    %24 = vector.extract_strided_slice %2 {offsets = [3, 0, 0], sizes = [1, 4, 1], strides = [1, 1, 1]} : vector<4x4x1xf32> to vector<1x4x1xf32>
    %25 = vector.broadcast %23 : vector<32x1x128xf32> to vector<32x4x128xf32>
    %26 = vector.broadcast %24 : vector<1x4x1xf32> to vector<32x4x128xf32>
    %27 = arith.mulf %25, %26 : vector<32x4x128xf32>
    %28 = arith.addf %22, %27 : vector<32x4x128xf32>
    %cst = arith.constant 0.000000e+00 : f32
    %29 = vector.broadcast %cst : f32 to vector<1x4x128xf32>
    %30 = vector.extract_strided_slice %28 {offsets = [0, 0, 0], sizes = [8, 4, 128], strides = [1, 1, 1]} : vector<32x4x128xf32> to vector<8x4x128xf32>
    %31 = vector.extract_strided_slice %3 {offsets = [0, 0, 0], sizes = [8, 4, 1], strides = [1, 1, 1]} : vector<32x4x1xf32> to vector<8x4x1xf32>
    %32 = vector.broadcast %31 : vector<8x4x1xf32> to vector<8x4x128xf32>
    %33 = arith.mulf %30, %32 : vector<8x4x128xf32>
    %cst_11 = arith.constant dense<0.000000e+00> : vector<4x128xf32>
    %34 = vector.multi_reduction <add>, %33, %cst_11 [0] : vector<8x4x128xf32> to vector<4x128xf32>
    %35 = vector.shape_cast %34 : vector<4x128xf32> to vector<1x4x128xf32>
    %36 = arith.addf %29, %35 : vector<1x4x128xf32>
    %37 = vector.extract_strided_slice %28 {offsets = [8, 0, 0], sizes = [8, 4, 128], strides = [1, 1, 1]} : vector<32x4x128xf32> to vector<8x4x128xf32>
    %38 = vector.extract_strided_slice %3 {offsets = [8, 0, 0], sizes = [8, 4, 1], strides = [1, 1, 1]} : vector<32x4x1xf32> to vector<8x4x1xf32>
    %39 = vector.broadcast %38 : vector<8x4x1xf32> to vector<8x4x128xf32>
    %40 = arith.mulf %37, %39 : vector<8x4x128xf32>
    %cst_12 = arith.constant dense<0.000000e+00> : vector<4x128xf32>
    %41 = vector.multi_reduction <add>, %40, %cst_12 [0] : vector<8x4x128xf32> to vector<4x128xf32>
    %42 = vector.shape_cast %41 : vector<4x128xf32> to vector<1x4x128xf32>
    %43 = arith.addf %36, %42 : vector<1x4x128xf32>
    %44 = vector.extract_strided_slice %28 {offsets = [16, 0, 0], sizes = [8, 4, 128], strides = [1, 1, 1]} : vector<32x4x128xf32> to vector<8x4x128xf32>
    %45 = vector.extract_strided_slice %3 {offsets = [16, 0, 0], sizes = [8, 4, 1], strides = [1, 1, 1]} : vector<32x4x1xf32> to vector<8x4x1xf32>
    %46 = vector.broadcast %45 : vector<8x4x1xf32> to vector<8x4x128xf32>
    %47 = arith.mulf %44, %46 : vector<8x4x128xf32>
    %cst_13 = arith.constant dense<0.000000e+00> : vector<4x128xf32>
    %48 = vector.multi_reduction <add>, %47, %cst_13 [0] : vector<8x4x128xf32> to vector<4x128xf32>
    %49 = vector.shape_cast %48 : vector<4x128xf32> to vector<1x4x128xf32>
    %50 = arith.addf %43, %49 : vector<1x4x128xf32>
    %51 = vector.extract_strided_slice %28 {offsets = [24, 0, 0], sizes = [8, 4, 128], strides = [1, 1, 1]} : vector<32x4x128xf32> to vector<8x4x128xf32>
    %52 = vector.extract_strided_slice %3 {offsets = [24, 0, 0], sizes = [8, 4, 1], strides = [1, 1, 1]} : vector<32x4x1xf32> to vector<8x4x1xf32>
    %53 = vector.broadcast %52 : vector<8x4x1xf32> to vector<8x4x128xf32>
    %54 = arith.mulf %51, %53 : vector<8x4x128xf32>
    %cst_14 = arith.constant dense<0.000000e+00> : vector<4x128xf32>
    %55 = vector.multi_reduction <add>, %54, %cst_14 [0] : vector<8x4x128xf32> to vector<4x128xf32>
    %56 = vector.shape_cast %55 : vector<4x128xf32> to vector<1x4x128xf32>
    %57 = arith.addf %50, %56 : vector<1x4x128xf32>
    %58 = vector.broadcast %5 : vector<1x4x1xf32> to vector<1x4x128xf32>
    %59 = arith.addf %57, %58 : vector<1x4x128xf32>
    %c0_15 = arith.constant 0 : index
    %c0_16 = arith.constant 0 : index
    %c0_17 = arith.constant 0 : index
    %60 = vector.load %arg6[%c0_15, %c0_16, %c0_17] : memref<1x1x128xf32, #tpu.memory_space<vmem>>, vector<1x1x128xf32>
    %61 = vector.shape_cast %60 : vector<1x1x128xf32> to vector<1x128xf32>
    %cst_18 = arith.constant 0.000000e+00 : f32
    %62 = vector.broadcast %cst_18 : f32 to vector<1x128xf32>
    %63 = arith.cmpf ogt, %61, %62 : vector<1x128xf32>
    %64 = vector.shape_cast %63 : vector<1x128xi1> to vector<1x1x128xi1>
    %cst_19 = arith.constant -3.000000e+01 : f32
    %65 = vector.shape_cast %64 : vector<1x1x128xi1> to vector<1x1x128xi1>
    %66 = vector.broadcast %65 : vector<1x1x128xi1> to vector<1x4x128xi1>
    %67 = vector.broadcast %cst_19 : f32 to vector<1x4x128xf32>
    %68 = arith.select %66, %59, %67 : vector<1x4x128xi1>, vector<1x4x128xf32>
    %cst_20 = arith.constant 0.000000e+00 : f32
    %69 = vector.broadcast %cst_20 : f32 to vector<1x4x128xf32>
    %70 = arith.subf %69, %68 : vector<1x4x128xf32>
    %71 = math.exp %70 : vector<1x4x128xf32>
    %cst_21 = arith.constant 1.000000e+00 : f32
    %72 = vector.broadcast %cst_21 : f32 to vector<1x4x128xf32>
    %73 = arith.addf %72, %71 : vector<1x4x128xf32>
    %74 = tpu.reciprocal %73 : vector<1x4x128xf32> -> vector<1x4x128xf32>
    %75 = vector.broadcast %74 : vector<1x4x128xf32> to vector<32x4x128xf32>
    %76 = arith.mulf %28, %75 : vector<32x4x128xf32>
    %c0_22 = arith.constant 0 : index
    %c0_23 = arith.constant 0 : index
    %c0_24 = arith.constant 0 : index
    %c0_25 = arith.constant 0 : index
    %77 = vector.load %arg7[%c0_22, %c0_23, %c0_24, %c0_25] : memref<1x32x4x128xf32, #tpu.memory_space<vmem>>, vector<1x32x4x128xf32>
    %78 = vector.shape_cast %77 : vector<1x32x4x128xf32> to vector<32x4x128xf32>
    %79 = vector.shape_cast %76 : vector<32x4x128xf32> to vector<1x32x4x128xf32>
    tpu.vector_store %arg7[%c0_22, %c0_23, %c0_24, %c0_25], %79 {strides = array<i32>} : memref<1x32x4x128xf32, #tpu.memory_space<vmem>>, vector<1x32x4x128xf32>,
    return
  }
  func.func @transform_0(%arg0: i32, %arg1: i32) -> (i32, i32, i32, i32) {
    %c0_i32 = arith.constant 0 : i32
    %c0_i32_0 = arith.constant 0 : i32
    %c0_i32_1 = arith.constant 0 : i32
    return %arg0, %c0_i32, %c0_i32_0, %arg1 : i32, i32, i32, i32
  }
  func.func @transform_1(%arg0: i32, %arg1: i32) -> (i32, i32, i32) {
    %c0_i32 = arith.constant 0 : i32
    %c0_i32_0 = arith.constant 0 : i32
    %c0_i32_1 = arith.constant 0 : i32
    %c0_i32_2 = arith.constant 0 : i32
    return %c0_i32, %c0_i32_0, %c0_i32_1 : i32, i32, i32
  }
  func.func @transform_2(%arg0: i32, %arg1: i32) -> (i32, i32, i32) {
    %c0_i32 = arith.constant 0 : i32
    %c0_i32_0 = arith.constant 0 : i32
    %c0_i32_1 = arith.constant 0 : i32
    %c0_i32_2 = arith.constant 0 : i32
    return %c0_i32, %c0_i32_0, %c0_i32_1 : i32, i32, i32
  }
  func.func @transform_3(%arg0: i32, %arg1: i32) -> (i32, i32) {
    %c0_i32 = arith.constant 0 : i32
    %c0_i32_0 = arith.constant 0 : i32
    %c0_i32_1 = arith.constant 0 : i32
    return %c0_i32, %c0_i32_0 : i32, i32
  }
  func.func @transform_4(%arg0: i32, %arg1: i32) -> (i32, i32, i32) {
    %c0_i32 = arith.constant 0 : i32
    %c0_i32_0 = arith.constant 0 : i32
    return %arg0, %c0_i32, %arg1 : i32, i32, i32
  }
  func.func @transform_5(%arg0: i32, %arg1: i32) -> (i32, i32, i32, i32) {
    %c0_i32 = arith.constant 0 : i32
    %c0_i32_0 = arith.constant 0 : i32
    %c0_i32_1 = arith.constant 0 : i32
    return %arg0, %c0_i32, %c0_i32_0, %arg1 : i32, i32, i32, i32
  }
}

</mosaic_0001>

<bundles_post_ra>
// kernel: vadscale_forward.1
= control target key start
LH: loop header
LB: loop body
LE: loop exit
PB: predicated region body
PF: predicated region fallthrough
CT: control target
= control target key end

     0   :  { %10 = vsyncpa [#allocation3], 0  ;;  %s2503_s0 = inlined_call_operand.hbm [shape: f32[2,32,4,200], index: 0, kind: input, shape index: {}]   ;;  %s2504_s1 = inlined_call_operand.vmem [shape: f32[4,4,1], index: 1, kind: input, shape index: {}]   ;;  %s2505_s2 = inlined_call_operand.vmem [shape: f32[32,4,1], index: 2, kind: input, shape index: {}]   ;;  %s2506_s3 = inlined_call_operand.vmem [shape: f32[4,1], index: 3, kind: input, shape index: {}]   ;;  %s2507_s4 = inlined_call_operand.vmem [shape: f32[2,1,200], index: 4, kind: input, shape index: {}]   ;;  %s2508_s5 = inlined_call_operand.hbm [shape: f32[2,32,4,200], index: 5, kind: output, shape index: {}]  }
   0x1   :  { %12 = vsyncpa [#allocation3 + $0x1], 0 }
   0x2   :  { %13 = vsyncpa [#allocation4], 0 }
   0x3   :  { %15 = vsyncpa [#allocation4 + $0x1], 0  ;;  %s1477_s18 = smov 0   ;;  %s1479_s19 = smov 0  }
   0x4   :  { %s1481_s20 = smov 0   ;;  %s1483_s21 = smov 0  }
   0x5   :  { %s1485_s22 = smov 0   ;;  %s1487_s23 = smov 0  }
   0x6   :  { %s1489_s24 = smov 0   ;;  %s1491_s25 = smov 0  }
   0x7 LB: > { %2521 = sst [smem:[#allocation8_spill]] %s1418_s20  ;;  %s1202_s26 = sadd.s32 4294967295, %s1438_s25   ;;  %s1438_s25 = sphi %s1491_s25, %s21_s25   ;;  %s1434_s24 = sphi %s1489_s24, %s2598_s24   ;;  %s1430_s23 = sphi %s1487_s23, %s2597_s23   ;;  %s1426_s22 = sphi %s1485_s22, %s2596_s22   ;;  %s1422_s21 = sphi %s1483_s21, %s2595_s21   ;;  %s1418_s20 = sphi %s1481_s20, %s2590_s20   ;;  %s1414_s19 = sphi %s1479_s19, %s2594_s19   ;;  %s1410_s18 = sphi %s1477_s18, %s2593_s18  }
   0x8   : > { %s1203_s27 = sadd.s32 4294967294, %s1438_s25   ;;  %s30_s28 = sadd.s32 1, %s1430_s23 }
   0x9   : > { %s33_s29 = sadd.s32 1, %s1434_s24  ;;  %p31_p0 = scmp.ge.s32.totalorder %s30_s28, 2 }
   0xa   : > { %s42_s30 = sadd.s32 1, %s1418_s20  ;;  %p49_p1 = scmp.ne.s32.totalorder %s1418_s20, %s1414_s19 }
   0xb   : > { %p50_p2 = scmp.eq.s32.totalorder %s1438_s25, 0  ;;  %s2600_s28 = smov (%p31_p0, %s30_s28), 0 }
   0xc   : > { %2522 = sst [smem:[#allocation9_spill]] %s2600_s28  ;;  %s2602_s29 = smov (!%p31_p0, %s33_s29), %s1434_s24 }
   0xd   : > { %s38_s6 = ssub.s32 %s1430_s23, %s2600_s28  ;;  %p1530_p3 = por %p50_p2, %p49_p1 }
   0xe   : > { %p35_p4 = scmp.ge.s32.totalorder %s2602_s29, 2  ;;  %p55_p5 = scmp.ne.s32.totalorder %s1414_s19, %s1410_s18 }
   0xf   : > { %p56_p6 = scmp.eq.s32.totalorder %s1202_s26, 0  ;;  %p172_p7 = scmp.eq.s32.totalorder %s1202_s26, 3 }
  0x10   : > { %s2604_s29 = smov (%p35_p4, %s2602_s29), 0  ;;  %p178_p10 = scmp.eq.s32.totalorder %s1203_s27, 3 }
  0x11   : > { %2524 = sst [smem:[#allocation10_spill]] %s2604_s29  ;;  %p1538_p8 = por %p56_p6, %p55_p5 }
  0x12   : > { %p1542_p9 = por %p172_p7, %p49_p1  ;;  %s37_s10 = ssub.s32 %s1434_s24, %s2604_s29 }
  0x13   : > { %s39_s11 = sor.u32 %s38_s6, %s37_s10  ;;  %p1548_p12 = por %p178_p10, %p55_p5 }
  0x14   : > { %p40_p11 = scmp.eq.s32.totalorder %s39_s11, 0  ;;  %p1230_p13 = scmp.lt.s32.totalorder %s1438_s25, 4 }
  0x15   : > { %s2527_s12 = scalar_select %p1548_p12, 1, 0 }
  0x16   : > { %s207_s13 = sand.u32 1, %s1418_s20   ;;  %s1207_s16 = sshll.u32 %s1434_s24, 6 }
  0x17   : > { %2528 = sst [smem:[#allocation11_spill]] %s2527_s12  ;;  %s1206_s15 = sshll.u32 %s207_s13, 7 }
  0x18   : > { %s1555_s14 = scalar_select %p40_p11, %s1418_s20, %s42_s30  }
  0x19   : > { %s215_s17 = sadd.s32 %s1430_s23, %s1207_s16  ;;  %s211_s26 = scalar_lea.vmem [#allocation2], %s1206_s15 }
  0x1a   : > { %2529 = sst [smem:[#allocation12_spill]] %s1555_s14  ;;  %s220_s28 = sshll.u32 %s211_s26, 4  ;;  %s221_s28 = int_to_ptr.vmem [resolvable:$true] %s220_s28 }
  0x1b   : > { %s1208_s29 = sshll.u32 %s215_s17, 2  ;;  %p1223_p0 = pnand %p1230_p13, %p1530_p3 }
  0x1c   : > { %s217_s10 = scalar_lea.hbm %s2503_s0, %s1208_s29  ;;  %s208_s12 = scalar_lea.sflag [#allocation3], %s207_s13 }
  0x1d   : > { %s218_s11 = sshll.u32 %s217_s10, 4  ;;  %s1440_s30 = smov 128   ;;  %s219_s11 = int_to_ptr.hbm [resolvable:$true] %s218_s11 }
  0x1e   : > { %s1441_s14 = smov 64   ;;  %s1442_s20 = smov 4  }
  0x1f   : > { %1225 = dma.hbm_to_vmem [thread:$0]  (!%p1223_p0), %s219_s11, 2048, %s221_s28, %s208_s12, %s1440_s30, %s1441_s14, %s1442_s20  }
  0x20   : > { %p1209_p1 = scmp.ge.s32.totalorder %s1438_s25, 1  ;;  %p238_p2 = scmp.lt.s32.totalorder %s1438_s25, 5 }
  0x22   : > { %p239_p4 = pnand %p1209_p1, %p238_p2 }
  0x24   : > { %242 = sbr.rel (%p239_p4) target bundleno = 348 (0x15c), region = 40 }
  0x29   : > { %s1567_s15 = sand.u32 1, %s1414_s19  }
  0x2a   : > { %s1210_s29 = sshll.u32 %s1567_s15, 7  ;;  %s245_s7 = scalar_lea.sflag [#allocation3], %s1567_s15 }
  0x2b   : > { %s1573_s16 = scalar_lea.vmem [#allocation2], %s1210_s29 }
  0x2c   : > { %1401 = dma.done.wait (%p1538_p8), %s245_s7, 2048  }
  0x2d   : > { %1403 = vsyncadd (%p1538_p8), %s245_s7, 4294965248  ;;  %v2513_v0 = vmov 0   ;;  %v326_v1 = vld [vmem:[%s2505_s2] sm:$0xf]  ;;  %v324_v2 = vld [vmem:[%s2504_s1 + $0x8] sm:$0xf] }
  0x2e   : > { %1305 = vset.pattern.permute.xlu2 %v2513_v0  ;;  %1304 = vset.pattern.permute.xlu1 %v2513_v0  ;;  %v322_v3 = vld [vmem:[%s2504_s1] sm:$0xf]  ;;  %v327_v4 = vld [vmem:[%s2505_s2 + $0x4] sm:$0xf]  ;;  %v325_v5 = vld [vmem:[%s2504_s1 + $0xc] sm:$0xf] }
  0x2f   : > { %1303 = vset.pattern.permute.xlu0 %v2513_v0  ;;  %733 = vperm.xlu2 %1305, %v326_v1   ;;  %v323_v6 = vld [vmem:[%s2504_s1 + $0x4] sm:$0xf]  ;;  %v330_v7 = vld [vmem:[%s2505_s2 + $0x10] sm:$0xf]  ;;  %v329_v8 = vld [vmem:[%s2505_s2 + $0xc] sm:$0xf] }
  0x30   : > { %563 = vperm.xlu1 %1304, %v324_v2   ;;  %393 = vperm.xlu0 %1303, %v322_v3   ;;  %v328_v9 = vld [vmem:[%s2505_s2 + $0x8] sm:$0xf]  ;;  %v333_v10 = vld [vmem:[%s2505_s2 + $0x1c] sm:$0xf]  ;;  %v332_v11 = vld [vmem:[%s2505_s2 + $0x18] sm:$0xf] }
  0x31   : > { %v331_v12 = vld [vmem:[%s2505_s2 + $0x14] sm:$0xf]  ;;  %v336_v13 = vld [vmem:[%s2505_s2 + $0x28] sm:$0xf]  ;;  %v335_v14 = vld [vmem:[%s2505_s2 + $0x24] sm:$0xf] }
  0x32   : > { %v334_v15 = vld [vmem:[%s2505_s2 + $0x20] sm:$0xf]  ;;  %v339_v16 = vld [vmem:[%s2505_s2 + $0x34] sm:$0xf]  ;;  %v338_v17 = vld [vmem:[%s2505_s2 + $0x30] sm:$0xf] }
  0x33   : > { %v337_v18 = vld [vmem:[%s2505_s2 + $0x2c] sm:$0xf]  ;;  %v342_v19 = vld [vmem:[%s2505_s2 + $0x40] sm:$0xf]  ;;  %v341_v20 = vld [vmem:[%s2505_s2 + $0x3c] sm:$0xf] }
  0x34   : > { %v340_v21 = vld [vmem:[%s2505_s2 + $0x38] sm:$0xf]  ;;  %v350_v22 = vld [vmem:[%s2505_s2 + $0x60] sm:$0xf]  ;;  %v344_v23 = vld [vmem:[%s2505_s2 + $0x48] sm:$0xf] }
  0x35   : > { %v343_v24 = vld [vmem:[%s2505_s2 + $0x44] sm:$0xf]  ;;  %v352_v25 = vld [vmem:[%s2505_s2 + $0x68] sm:$0xf]  ;;  %v345_v26 = vld [vmem:[%s2505_s2 + $0x4c] sm:$0xf] }
  0x36   : > { %v351_v27 = vld [vmem:[%s2505_s2 + $0x64] sm:$0xf]  ;;  %v347_v28 = vld [vmem:[%s2505_s2 + $0x54] sm:$0xf]  ;;  %v353_v29 = vld [vmem:[%s2505_s2 + $0x6c] sm:$0xf] }
  0x37   : > { %738 = vperm.xlu2 %1305, %v327_v4   ;;  %v346_v30 = vld [vmem:[%s2505_s2 + $0x50] sm:$0xf]  ;;  %v355_v31 = vld [vmem:[%s2505_s2 + $0x74] sm:$0xf]  ;;  %v348_v32 = vld [vmem:[%s2505_s2 + $0x58] sm:$0xf] }
  0x38   : > { %664 = vperm.xlu1 %1304, %v325_v5   ;;  %462 = vperm.xlu0 %1303, %v323_v6   ;;  %v354_v33 = vld [vmem:[%s2505_s2 + $0x70] sm:$0xf]  ;;  %v357_v34 = vld [vmem:[%s2505_s2 + $0x7c] sm:$0xf]  ;;  %v356_v35 = vld [vmem:[%s2505_s2 + $0x78] sm:$0xf] }
  0x39   : > { %v349_v36 = vld [vmem:[%s2505_s2 + $0x5c] sm:$0xf]  ;;  %v358_v38 = vld [vmem:[%s2506_s3] sm:$0xf]  ;;  %v1696_v39 = vld [vmem:[%s1573_s16 + $0x34] sm:$0xf] }
  0x3a   : > { %v1699_v40 = vld [vmem:[%s1573_s16 + $0xc] sm:$0xf]  ;;  %v1704_v42 = vld [vmem:[%s1573_s16] sm:$0xf]  ;;  %v1707_v43 = vld [vmem:[%s1573_s16 + $0x4] sm:$0xf] }
  0x3b   : > { %v372_v44 = vperm.slane %v1696_v39, 0  ;;  %v542_v45 = vperm.slane %v1696_v39, 2  ;;  %v362_v46 = vperm.slane %v1699_v40, 0  ;;  %v532_v47 = vperm.slane %v1699_v40, 2  ;;  %v1714_v48 = vld [vmem:[%s1573_s16 + $0x8] sm:$0xf] }
  0x3c   : > { %v359_v49 = vperm.slane %v1704_v42, 0  ;;  %v360_v50 = vperm.slane %v1707_v43, 0  ;;  %v1719_v51 = vld [vmem:[%s1573_s16 + $0x40] sm:$0xf]  ;;  %v1722_v52 = vld [vmem:[%s1573_s16 + $0x18] sm:$0xf] }
  0x3d   : > { %v1725_v53 = vld [vmem:[%s1573_s16 + $0x10] sm:$0xf]  ;;  %v1728_v54 = vld [vmem:[%s1573_s16 + $0x14] sm:$0xf]  ;;  %v1731_v55 = vld [vmem:[%s1573_s16 + $0x1c] sm:$0xf] }
  0x3e   : > { %v361_v56 = vperm.slane %v1714_v48, 0  ;;  %v529_v57 = vperm.slane %v1704_v42, 2  ;;  %v530_v58 = vperm.slane %v1707_v43, 2  ;;  %v531_v59 = vperm.slane %v1714_v48, 2  ;;  %p283_p3 = scmp.lt.s32.totalorder %s1426_s22, 1  ;;  %p285_p5 = scmp.lt.s32.totalorder %s1422_s21, 1 }
  0x3f   : > { %753 = vperm.xlu2 %1305, %v330_v7   ;;  %v375_v60 = vperm.slane %v1719_v51, 0  ;;  %v545_v61 = vperm.slane %v1719_v51, 2  ;;  %v365_v62 = vperm.slane %v1722_v52, 0  ;;  %v535_v63 = vperm.slane %v1722_v52, 2  ;;  %s2377_s10 = scalar_lea.vmem [#allocation5], %s1210_s29  ;;  %s1214_s29 = sshll.u32 %s1426_s22, 6 }
  0x40   : > { %748 = vperm.xlu1 %1304, %v329_v8   ;;  %743 = vperm.xlu0 %1303, %v328_v9   ;;  %v441_v1 = vperm.slane %v1696_v39, 1  ;;  %v363_v2 = vperm.slane %v1725_v53, 0  ;;  %v364_v3 = vperm.slane %v1728_v54, 0  ;;  %v366_v4 = vperm.slane %v1731_v55, 0  ;;  %s2290_s14 = scalar_select %p283_p3, %s1426_s22, 1 }
  0x41   : > { %v431_v7 = vperm.slane %v1699_v40, 1  ;;  %v428_v9 = vperm.slane %v1704_v42, 1  ;;  %vm779_vm0 = vcmask 1043456   ;;  %s286_s17 = scalar_select %p285_p5, %s1422_s21, 1 }
  0x42   : > { %s1212_s8 = sshll.u32 %s2290_s14, 1  ;;  %s1093_s11 = sadd.s32 %s1422_s21, %s1214_s29 }
  0x43   : > { %s1215_s22 = sshll.u32 %s1093_s11, 2  ;;  %s1096_s20 = sshll.u32 %s2377_s10, 4  ;;  %s1097_s20 = int_to_ptr.vmem [resolvable:$true] %s1096_s20 }
  0x44   : > { %s1095_s7 = scalar_lea.hbm %s2508_s5, %s1215_s22  ;;  %s1083_s12 = scalar_lea.sflag [#allocation4], %s1567_s15 }
  0x45   : > { %s1098_s28 = sshll.u32 %s1095_s7, 4  ;;  %s1099_s28 = int_to_ptr.hbm [resolvable:$true] %s1098_s28 }
  0x46   : > { %s1354_s13 = sshra.s32 %s1099_s28, 4  ;;  %s1355_s13 = int_to_ptr.hbm [resolvable:$true] %s1354_s13 }
  0x47   : > { %768 = vperm.xlu2 %1305, %v333_v10   ;;  %v429_v10 = vperm.slane %v1707_v43, 1  ;;  %s1356_s14 = scalar_lea.hbm %s1355_s13, 128  ;;  %p1361_p10 = scmp.lt.s32.totalorder %s1355_s13, %s2508_s5 }
  0x48   : > { %763 = vperm.xlu1 %1304, %v332_v11   ;;  %758 = vperm.xlu0 %1303, %v331_v12   ;;  %v430_v11 = vperm.slane %v1714_v48, 1  ;;  %v630_v12 = vperm.slane %v1704_v42, 3  ;;  %p1357_p6 = scmp.ne.s32.totalorder %s1355_s13, %s1356_s14 }
  0x4a   : > { %p1358_p7 = pnand %p1357_p6, %p1542_p9 }
  0x4c   : > { %p1359_p8 = pneg %p1358_p7 }
  0x4f   : > { %808 = vperm.xlu2 %1305, %v336_v13   ;;  %v631_v13 = vperm.slane %v1707_v43, 3  ;;  %v2536_v43 = vperm.slane %v1725_v53, 1 }
  0x50   : > { %803 = vperm.xlu1 %1304, %v335_v14   ;;  %798 = vperm.xlu0 %1303, %v334_v15   ;;  %v1756_v14 = vld [vmem:[%s1573_s16 + $0x60] sm:$0xf] }
  0x57   : > { %823 = vperm.xlu2 %1305, %v339_v16  }
  0x58   : > { %818 = vperm.xlu1 %1304, %v338_v17   ;;  %813 = vperm.xlu0 %1303, %v337_v18   ;;  %v1794_v17 = vld [vmem:[%s1573_s16 + $0x2c] sm:$0xf] }
  0x5f   : > { %862 = vperm.xlu2 %1305, %v342_v19   ;;  %v1763_v19 = vld [vmem:[%s1573_s16 + $0x24] sm:$0xf] }
  0x60   : > { %833 = vperm.xlu1 %1304, %v341_v20   ;;  %828 = vperm.xlu0 %1303, %v340_v21   ;;  %v1791_v20 = vld [vmem:[%s1573_s16 + $0x28] sm:$0xf] }
  0x67   : > { %926 = vperm.xlu2 %1305, %v350_v22  }
  0x68   : > { %872 = vperm.xlu1 %1304, %v344_v23   ;;  %867 = vperm.xlu0 %1303, %v343_v24   ;;  %v1770_v24 = vld [vmem:[%s1573_s16 + $0x20] sm:$0xf] }
  0x6f   : > { %936 = vperm.xlu2 %1305, %v352_v25   ;;  %v533_v25 = vperm.slane %v1725_v53, 2 }
  0x70   : > { %877 = vperm.xlu1 %1304, %v345_v26   ;;  %931 = vperm.xlu0 %1303, %v351_v27   ;;  %v534_v26 = vperm.slane %v1728_v54, 2  ;;  %v536_v27 = vperm.slane %v1731_v55, 2 }
  0x77   : > { %887 = vperm.xlu2 %1305, %v347_v28   ;;  %v383_v28 = vperm.slane %v1756_v14, 0 }
  0x78   : > { %941 = vperm.xlu1 %1304, %v353_v29   ;;  %882 = vperm.xlu0 %1303, %v346_v30   ;;  %v553_v29 = vperm.slane %v1756_v14, 2  ;;  %v368_v30 = vperm.slane %v1763_v19, 0 }
  0x7f   : > { %951 = vperm.xlu2 %1305, %v355_v31   ;;  %v1779_v31 = vld [vmem:[%s1573_s16 + $0x68] sm:$0xf] }
  0x80   : > { %892 = vperm.xlu1 %1304, %v348_v32   ;;  %946 = vperm.xlu0 %1303, %v354_v33   ;;  %v1782_v32 = vld [vmem:[%s1573_s16 + $0x30] sm:$0xf] }
  0x87   : > { %961 = vperm.xlu2 %1305, %v357_v34  }
  0x88   : > { %956 = vperm.xlu1 %1304, %v356_v35   ;;  %897 = vperm.xlu0 %1303, %v349_v36  }
  0x89   : > { %v1690_v37 = vpop.permute.xlu2 %733 }
  0x90   : > { %990 = vperm.xlu0 %1303, %v358_v38  }
  0x91   : > { %v1701_v41 = vpop.permute.xlu2 %738 }
  0x99   : > { %v1745_v5 = vpop.permute.xlu2 %753 }
  0xa1   : > { %v1796_v23 = vpop.permute.xlu2 %768 }
  0xa2   : > { %2530 = vst [vmem:[#allocation13_spill] sm:$0xff] %v1796_v23  ;;  %v1798_v22 = vpop.permute.xlu1 %563  ;;  %v1804_v36 = vpop.permute.xlu0 %393 }
  0xa3   : > { %v579_v8 = vmul.f32 %v1798_v22, %v542_v45  ;;  %v569_v6 = vmul.f32 %v1798_v22, %v532_v47  ;;  %v566_v38 = vmul.f32 %v1798_v22, %v529_v57  ;;  %v567_v21 = vmul.f32 %v1798_v22, %v530_v58 }
  0xa4   : > { %v409_v0 = vmul.f32 %v1804_v36, %v372_v44  ;;  %v399_v45 = vmul.f32 %v1804_v36, %v362_v46  ;;  %v396_v47 = vmul.f32 %v1804_v36, %v359_v49  ;;  %v397_v57 = vmul.f32 %v1804_v36, %v360_v50 }
  0xa5   : > { %v398_v58 = vmul.f32 %v1804_v36, %v361_v56  ;;  %v568_v44 = vmul.f32 %v1798_v22, %v531_v59  ;;  %v412_v46 = vmul.f32 %v1804_v36, %v375_v60  ;;  %v1858_v49 = vmul.f32 %v1798_v22, %v545_v61 }
  0xa6   : > { %v402_v56 = vmul.f32 %v1804_v36, %v365_v62  ;;  %v1870_v59 = vmul.f32 %v1798_v22, %v535_v63  ;;  %v400_v60 = vmul.f32 %v1804_v36, %v363_v2  ;;  %v401_v61 = vmul.f32 %v1804_v36, %v364_v3 }
  0xa7   : > { %v1883_v62 = vmul.f32 %v1804_v36, %v366_v4  ;;  %v570_v35 = vmul.f32 %v1798_v22, %v533_v25  ;;  %v1887_v63 = vmul.f32 %v1798_v22, %v534_v26  ;;  %v1890_v16 = vmul.f32 %v1798_v22, %v536_v27 }
  0xa9   : > { %v1860_v33 = vpop.permute.xlu2 %808 }
  0xaa   : > { %2531 = vst [vmem:[#allocation14_spill] sm:$0xff] %v1860_v33  ;;  %v1862_v50 = vpop.permute.xlu1 %664  ;;  %v1878_v18 = vpop.permute.xlu0 %462 }
  0xab   : > { %v478_v2 = vmul.f32 %v1878_v18, %v441_v1  ;;  %v468_v3 = vmul.f32 %v1878_v18, %v431_v7  ;;  %v465_v4 = vmul.f32 %v1878_v18, %v428_v9  ;;  %v466_v25 = vmul.f32 %v1878_v18, %v429_v10 }
  0xac   : > { %v467_v26 = vmul.f32 %v1878_v18, %v430_v11  ;;  %v1910_v1 = vmul.f32 %v1804_v36, %v383_v28  ;;  %v1915_v7 = vmul.f32 %v1798_v22, %v553_v29  ;;  %v1920_v9 = vmul.f32 %v1804_v36, %v368_v30 }
  0xad   : > { %v510_v10 = vadd.f32 %v478_v2, %v409_v0  ;;  %v500_v27 = vadd.f32 %v468_v3, %v399_v45  ;;  %v497_v34 = vadd.f32 %v465_v4, %v396_v47  ;;  %v498_v15 = vadd.f32 %v466_v25, %v397_v57 }
  0xae   : > { %2532 = vst [vmem:[#allocation15_spill] sm:$0xff] %v1915_v7  ;;  %v499_v11 = vadd.f32 %v467_v26, %v398_v58  ;;  %v667_v28 = vmul.f32 %v1862_v50, %v630_v12  ;;  %v668_v33 = vmul.f32 %v1862_v50, %v631_v13  ;;  %v2533_v29 = vperm.slane %v1714_v48, 3 }
  0xaf   : > { %v598_v7 = vadd.f32 %v566_v38, %v497_v34  ;;  %v599_v30 = vadd.f32 %v567_v21, %v498_v15  ;;  %v2534_v0 = vperm.slane %v1719_v51, 1  ;;  %v2535_v47 = vperm.slane %v1722_v52, 1 }
  0xb0   : > { %v669_v23 = vmul.f32 %v1862_v50, %v2533_v29  ;;  %v611_v57 = vadd.f32 %v579_v8, %v510_v10  ;;  %v601_v12 = vadd.f32 %v569_v6, %v500_v27  ;;  %v600_v58 = vadd.f32 %v568_v44, %v499_v11 }
  0xb1   : > { %v481_v45 = vmul.f32 %v1878_v18, %v2534_v0  ;;  %v471_v42 = vmul.f32 %v1878_v18, %v2535_v47  ;;  %v469_v13 = vmul.f32 %v1878_v18, %v2536_v43  ;;  %v824_v48 = vpop.permute.xlu2 %823  ;;  %v1940_v3 = vadd.f32 %v667_v28, %v598_v7 }
  0xb2   : > { %v749_v2 = vpop.permute.xlu1 %748  ;;  %v1942_v15 = vadd.f32 %v668_v33, %v599_v30  ;;  %v2537_v21 = vperm.slane %v1763_v19, 2  ;;  %v2538_v38 = vperm.slane %v1770_v24, 0  ;;  %v2539_v8 = vperm.slane %v1696_v39, 3  ;;  %v744_v26 = vpop.permute.xlu0 %743 }
  0xb3   : > { %v2540_v4 = vperm.slane %v1699_v40, 3  ;;  %v1958_v33 = vadd.f32 %v669_v23, %v600_v58  ;;  %v2541_v7 = vperm.slane %v1728_v54, 1  ;;  %v771_v27 = vmul.f32 %v1690_v37, %v1940_v3 }
  0xb4   : > { %v1947_v34 = vmul.f32 %v1798_v22, %v2537_v21  ;;  %v404_v6 = vmul.f32 %v1804_v36, %v2538_v38  ;;  %v680_v44 = vmul.f32 %v1862_v50, %v2539_v8  ;;  %v772_v11 = vmul.f32 %v1701_v41, %v1942_v15 }
  0xb5   : > { %v670_v25 = vmul.f32 %v1862_v50, %v2540_v4  ;;  %v470_v10 = vmul.f32 %v1878_v18, %v2541_v7  ;;  %v513_v39 = vadd.f32 %v481_v45, %v412_v46  ;;  %v2542_v28 = vperm.slane %v1770_v24, 2 }
  0xb6   : > { %v1970_v29 = vadd.f32 %v680_v44, %v611_v57  ;;  %v503_v23 = vadd.f32 %v471_v42, %v402_v56  ;;  %v501_v0 = vadd.f32 %v469_v13, %v400_v60  ;;  %v773_v47 = vmul.f32 %v744_v26, %v1958_v33 }
  0xb7   : > { %v574_v40 = vmul.f32 %v1798_v22, %v2542_v28  ;;  %v1972_v30 = vadd.f32 %v670_v25, %v601_v12  ;;  %v780_v58 = vsel %vm779_vm0, %v771_v27, 0.0  ;;  %v781_v37 = vsel %vm779_vm0, %v772_v11, 0.0 }
  0xb8   : > { %v2543_v43 = vperm.slane %v1779_v31, 0  ;;  %v782_v46 = vadd.f32 %v781_v37, %v780_v58  ;;  %v2544_v45 = vperm.slane %v1731_v55, 1  ;;  %v502_v12 = vadd.f32 %v470_v10, %v401_v61 }
  0xb9   : > { %v2545_v56 = vperm.slane %v1779_v31, 2  ;;  %v614_v42 = vadd.f32 %v1858_v49, %v513_v39  ;;  %v602_v13 = vadd.f32 %v570_v35, %v501_v0  ;;  %v2546_v21 = vperm.slane %v1725_v53, 3  ;;  %v863_v49 = vpop.permute.xlu2 %862 }
  0xba   : > { %v1980_v41 = vmul.f32 %v1804_v36, %v2543_v43  ;;  %v472_v57 = vmul.f32 %v1878_v18, %v2544_v45  ;;  %v2547_v8 = vperm.slane %v1782_v32, 0  ;;  %v841_v4 = vmul.f32 %v824_v48, %v1970_v29  ;;  %v764_v53 = vpop.permute.xlu1 %763 }
  0xbb   : > { %v1988_v60 = vmul.f32 %v1798_v22, %v2545_v56  ;;  %v671_v38 = vmul.f32 %v1862_v50, %v2546_v21  ;;  %v774_v61 = vmul.f32 %v749_v2, %v1972_v30  ;;  %v2548_v25 = vperm.slane %v1719_v51, 3  ;;  %v759_v2 = vpop.permute.xlu0 %758 }
  0xbc   : > { %v408_v44 = vmul.f32 %v1804_v36, %v2547_v8  ;;  %v604_v7 = vadd.f32 %v1870_v59, %v503_v23  ;;  %v783_v35 = vsel %vm779_vm0, %v773_v47, 0.0  ;;  %v603_v10 = vadd.f32 %v1887_v63, %v502_v12 }
  0xbd   : > { %v683_v26 = vmul.f32 %v1862_v50, %v2548_v25  ;;  %v2005_v27 = vadd.f32 %v671_v38, %v602_v13  ;;  %v2549_v11 = vperm.slane %v1763_v19, 1  ;;  %v784_v39 = vadd.f32 %v783_v35, %v782_v46 }
  0xbe   : > { %v504_v51 = vadd.f32 %v472_v57, %v1883_v62  ;;  %v2550_v28 = vperm.slane %v1782_v32, 2  ;;  %v2551_v23 = vperm.slane %v1791_v20, 0  ;;  %v2552_v47 = vperm.slane %v1722_v52, 3 }
  0xbf   : > { %v474_v48 = vmul.f32 %v1878_v18, %v2549_v11  ;;  %v2019_v63 = vadd.f32 %v683_v26, %v614_v42  ;;  %v2553_v37 = vperm.slane %v1728_v54, 3  ;;  %v2554_v62 = vperm.slane %v1794_v17, 0 }
  0xc0   : > { %v2014_v59 = vmul.f32 %v1798_v22, %v2550_v28  ;;  %v406_v0 = vmul.f32 %v1804_v36, %v2551_v23  ;;  %v673_v58 = vmul.f32 %v1862_v50, %v2552_v47  ;;  %v775_v45 = vmul.f32 %v1745_v5, %v2005_v27 }
  0xc1   : > { %v672_v43 = vmul.f32 %v1862_v50, %v2553_v37  ;;  %v407_v46 = vmul.f32 %v1804_v36, %v2554_v62  ;;  %v2555_v57 = vperm.slane %v1756_v14, 1  ;;  %v506_v56 = vadd.f32 %v474_v48, %v1920_v9 }
  0xc2   : > { %v2556_v52 = vperm.slane %v1770_v24, 1  ;;  %v2040_v54 = vsel %vm779_vm0, %v841_v4, 0.0  ;;  %v785_v13 = vsel %vm779_vm0, %v774_v61, 0.0  ;;  %v2043_v21 = vadd.f32 %v673_v58, %v604_v7 }
  0xc3   : > { %v489_v12 = vmul.f32 %v1878_v18, %v2555_v57  ;;  %v2045_v38 = vadd.f32 %v672_v43, %v603_v10  ;;  %v786_v5 = vadd.f32 %v785_v13, %v784_v39  ;;  %v900_v8 = vmul.f32 %v863_v49, %v2019_v63  ;;  %v799_v43 = vpop.permute.xlu0 %798 }
  0xc4   : > { %v473_v42 = vmul.f32 %v1878_v18, %v2556_v52  ;;  %v605_v25 = vadd.f32 %v1890_v16, %v504_v51  ;;  %v777_v9 = vmul.f32 %v764_v53, %v2043_v21  ;;  %v2557_v35 = vperm.slane %v1731_v55, 3  ;;  %v927_v53 = vpop.permute.xlu2 %926  ;;  %v804_v55 = vpop.permute.xlu1 %803 }
  0xc5   : > { %v776_v4 = vmul.f32 %v759_v2, %v2045_v38  ;;  %v2558_v61 = vperm.slane %v1756_v14, 3  ;;  %v787_v10 = vsel %vm779_vm0, %v775_v45, 0.0  ;;  %v521_v48 = vadd.f32 %v489_v12, %v1910_v1 }
  0xc6   : > { %v505_v26 = vadd.f32 %v473_v42, %v404_v6  ;;  %v674_v11 = vmul.f32 %v1862_v50, %v2557_v35  ;;  %v607_v49 = vadd.f32 %v1947_v34, %v506_v56  ;;  %v2559_v16 = vperm.slane %v1779_v31, 1  ;;  %v2565_v42 = vld [vmem:[#allocation15_spill] sm:$0xff] }
  0xc7   : > { %v691_v7 = vmul.f32 %v1862_v50, %v2558_v61  ;;  %v2560_v51 = vperm.slane %v1782_v32, 1  ;;  %v2561_v14 = vperm.slane %v1791_v20, 1  ;;  %v2562_v23 = vperm.slane %v1794_v17, 1 }
  0xc8   : > { %v491_v6 = vmul.f32 %v1878_v18, %v2559_v16  ;;  %v606_v39 = vadd.f32 %v574_v40, %v505_v26  ;;  %v2073_v34 = vsel %vm779_vm0, %v900_v8, 0.0  ;;  %v2075_v47 = vadd.f32 %v674_v11, %v605_v25 }
  0xc9   : > { %v477_v2 = vmul.f32 %v1878_v18, %v2560_v51  ;;  %v475_v28 = vmul.f32 %v1878_v18, %v2561_v14  ;;  %v476_v1 = vmul.f32 %v1878_v18, %v2562_v23  ;;  %v788_v58 = vadd.f32 %v787_v10, %v786_v5 }
  0xca   : > { %v2563_v40 = vperm.slane %v1763_v19, 3  ;;  %v789_v62 = vsel %vm779_vm0, %v776_v4, 0.0  ;;  %v2564_v45 = vperm.slane %v1770_v24, 3  ;;  %v791_v52 = vsel %vm779_vm0, %v777_v9, 0.0 }
  0xcb   : > { %v507_v12 = vadd.f32 %v475_v28, %v406_v0  ;;  %v508_v56 = vadd.f32 %v476_v1, %v407_v46  ;;  %v622_v13 = vadd.f32 %v2565_v42, %v521_v48  ;;  %v523_v5 = vadd.f32 %v491_v6, %v1980_v41  ;;  %v2098_v46 = vld [vmem:[%s1573_s16 + $0x54] sm:$0xf] }
  0xcc   : > { %v676_v37 = vmul.f32 %v1862_v50, %v2563_v40  ;;  %v675_v57 = vmul.f32 %v1862_v50, %v2564_v45  ;;  %v509_v25 = vadd.f32 %v477_v2, %v408_v44  ;;  %v2566_v26 = vperm.slane %v1791_v20, 2  ;;  %v2568_v44 = vld [vmem:[#allocation13_spill] sm:$0xff]  ;;  %v819_v2 = vpop.permute.xlu1 %818  ;;  %v814_v40 = vpop.permute.xlu0 %813 }
  0xcd   : > { %v2567_v24 = vperm.slane %v1794_v17, 2  ;;  %v790_v9 = vadd.f32 %v789_v62, %v788_v58  ;;  %v640_v4 = vperm.slane %v1791_v20, 3  ;;  %v641_v41 = vperm.slane %v1794_v17, 3 }
  0xce   : > { %v2086_v8 = vadd.f32 %v676_v37, %v607_v49  ;;  %v2089_v19 = vadd.f32 %v675_v57, %v606_v39  ;;  %v576_v35 = vmul.f32 %v1798_v22, %v2566_v26  ;;  %v2105_v61 = vmul.f32 %v2568_v44, %v2075_v47  ;;  %v304_v57 = vld [vmem:[%s1573_s16 + $0x38] sm:$0xf]  ;;  %v2152_v44 = vld [vmem:[%s1573_s16 + $0x74] sm:$0xf] }
  0xcf   : > { %v577_v0 = vmul.f32 %v1798_v22, %v2567_v24  ;;  %v2108_v16 = vadd.f32 %v691_v7, %v622_v13  ;;  %v677_v6 = vmul.f32 %v1862_v50, %v640_v4  ;;  %v380_v39 = vperm.slane %v2098_v46, 0  ;;  %v2120_v7 = vld [vmem:[%s1573_s16 + $0x3c] sm:$0xf] }
  0xd0   : > { %v837_v11 = vmul.f32 %v804_v55, %v2086_v8  ;;  %v836_v10 = vmul.f32 %v799_v43, %v2089_v19  ;;  %v608_v48 = vadd.f32 %v576_v35, %v507_v12  ;;  %v449_v55 = vperm.slane %v2098_v46, 1  ;;  %v937_v43 = vpop.permute.xlu2 %936 }
  0xd1   : > { %v609_v49 = vadd.f32 %v577_v0, %v508_v56  ;;  %2569 = vst [vmem:[#allocation15_spill] sm:$0xff] %v2108_v16  ;;  %v624_v20 = vadd.f32 %v1988_v60, %v523_v5  ;;  %v2570_v17 = vperm.slane %v1779_v31, 3  ;;  %v610_v14 = vadd.f32 %v2014_v59, %v509_v25  ;;  %v2573_v5 = vld [vmem:[#allocation14_spill] sm:$0xff] }
  0xd2   : > { %v678_v28 = vmul.f32 %v1862_v50, %v641_v41  ;;  %v2122_v23 = vadd.f32 %v791_v52, %v790_v9  ;;  %v845_v1 = vsel %vm779_vm0, %v837_v11, 0.0  ;;  %v2571_v58 = vperm.slane %v1782_v32, 3 }
  0xd3   : > { %v693_v51 = vmul.f32 %v1862_v50, %v2570_v17  ;;  %v2128_v31 = vadd.f32 %v677_v6, %v608_v48  ;;  %v844_v37 = vsel %vm779_vm0, %v836_v10, 0.0  ;;  %v486_v59 = vmul.f32 %v1878_v18, %v449_v55 }
  0xd4   : > { %v679_v60 = vmul.f32 %v1862_v50, %v2571_v58  ;;  %v2131_v62 = vadd.f32 %v678_v28, %v609_v49  ;;  %v443_v45 = vperm.slane %v2120_v7, 1  ;;  %v964_v12 = vmul.f32 %v927_v53, %v2108_v16 }
  0xd5   : > { %v417_v32 = vmul.f32 %v1804_v36, %v380_v39  ;;  %v550_v56 = vperm.slane %v2098_v46, 2  ;;  %v374_v52 = vperm.slane %v2120_v7, 0  ;;  %v2140_v42 = vadd.f32 %v693_v51, %v624_v20  ;;  %v834_v20 = vpop.permute.xlu1 %833 }
  0xd6   : > { %v2142_v13 = vadd.f32 %v679_v60, %v610_v14  ;;  %v838_v25 = vmul.f32 %v2573_v5, %v2128_v31  ;;  %v839_v26 = vmul.f32 %v814_v40, %v2131_v62  ;;  %v846_v35 = vadd.f32 %v845_v1, %v844_v37  ;;  %v829_v14 = vpop.permute.xlu0 %828 }
  0xd7   : > { %2572 = vst [vmem:[#allocation13_spill] sm:$0xff] %v2140_v42  ;;  %v518_v24 = vadd.f32 %v486_v59, %v417_v32  ;;  %v373_v0 = vperm.slane %v304_v57, 0  ;;  %v442_v53 = vperm.slane %v304_v57, 1  ;;  %v966_v9 = vmul.f32 %v937_v43, %v2140_v42  ;;  %v2168_v43 = vld [vmem:[%s1573_s16 + $0x48] sm:$0xf] }
  0xd8   : > { %v840_v11 = vmul.f32 %v819_v2, %v2142_v13  ;;  %v651_v4 = vperm.slane %v2098_v46, 3  ;;  %v480_v41 = vmul.f32 %v1878_v18, %v443_v45  ;;  %v587_v10 = vmul.f32 %v1798_v22, %v550_v56  ;;  %v310_v42 = vld [vmem:[%s1573_s16 + $0x50] sm:$0xf] }
  0xd9   : > { %v411_v48 = vmul.f32 %v1804_v36, %v374_v52  ;;  %v544_v49 = vperm.slane %v2120_v7, 2  ;;  %v479_v6 = vmul.f32 %v1878_v18, %v442_v53  ;;  %v847_v39 = vsel %vm779_vm0, %v838_v25, 0.0 }
  0xda   : > { %v849_v55 = vsel %vm779_vm0, %v839_v26, 0.0  ;;  %v410_v46 = vmul.f32 %v1804_v36, %v373_v0  ;;  %v543_v17 = vperm.slane %v304_v57, 2  ;;  %v848_v51 = vadd.f32 %v847_v39, %v846_v35  ;;  %v307_v0 = vld [vmem:[%s1573_s16 + $0x44] sm:$0xf] }
  0xdb   : > { %v619_v2 = vadd.f32 %v587_v10, %v518_v24  ;;  %v388_v28 = vperm.slane %v2152_v44, 0  ;;  %v457_v1 = vperm.slane %v2152_v44, 1  ;;  %v2164_v58 = vsel %vm779_vm0, %v964_v12, 0.0  ;;  %v888_v12 = vpop.permute.xlu2 %887 }
  0xdc   : > { %v512_v60 = vadd.f32 %v480_v41, %v411_v48  ;;  %v645_v40 = vperm.slane %v2120_v7, 3  ;;  %v511_v37 = vadd.f32 %v479_v6, %v410_v46  ;;  %v850_v59 = vadd.f32 %v849_v55, %v848_v51 }
  0xdd   : > { %v688_v45 = vmul.f32 %v1862_v50, %v651_v4  ;;  %v644_v32 = vperm.slane %v304_v57, 3  ;;  %v494_v56 = vmul.f32 %v1878_v18, %v457_v1  ;;  %v2173_v52 = vsel %vm779_vm0, %v966_v9, 0.0  ;;  %v2189_v39 = vpop.permute.xlu1 %872 }
  0xde   : > { %v851_v5 = vsel %vm779_vm0, %v840_v11, 0.0  ;;  %v581_v25 = vmul.f32 %v1798_v22, %v544_v49  ;;  %v580_v7 = vmul.f32 %v1798_v22, %v543_v17  ;;  %v425_v35 = vmul.f32 %v1804_v36, %v388_v28  ;;  %v868_v1 = vpop.permute.xlu0 %867 }
  0xdf   : > { %v2178_v26 = vadd.f32 %v688_v45, %v619_v2  ;;  %v558_v24 = vperm.slane %v2152_v44, 2  ;;  %v377_v57 = vperm.slane %v2168_v43, 0  ;;  %v682_v9 = vmul.f32 %v1862_v50, %v645_v40 }
  0xe0   : > { %v613_v53 = vadd.f32 %v581_v25, %v512_v60  ;;  %v612_v4 = vadd.f32 %v580_v7, %v511_v37  ;;  %v446_v11 = vperm.slane %v2168_v43, 1  ;;  %v852_v41 = vadd.f32 %v851_v5, %v850_v59 }
  0xe1   : > { %2574 = vst [vmem:[#allocation14_spill] sm:$0xff] %v2178_v26  ;;  %v905_v10 = vmul.f32 %v888_v12, %v2178_v26  ;;  %v681_v48 = vmul.f32 %v1862_v50, %v644_v32  ;;  %v526_v49 = vadd.f32 %v494_v56, %v425_v35  ;;  %v659_v6 = vperm.slane %v2152_v44, 3  ;;  %v2205_v12 = vld [vmem:[%s1573_s16 + $0x7c] sm:$0xf] }
  0xe2   : > { %v483_v55 = vmul.f32 %v1878_v18, %v446_v11  ;;  %v376_v46 = vperm.slane %v307_v0, 0  ;;  %v445_v17 = vperm.slane %v307_v0, 1  ;;  %v595_v51 = vmul.f32 %v1798_v22, %v558_v24 }
  0xe3   : > { %v414_v2 = vmul.f32 %v1804_v36, %v377_v57  ;;  %v547_v28 = vperm.slane %v2168_v43, 2  ;;  %v546_v60 = vperm.slane %v307_v0, 2  ;;  %v2195_v40 = vadd.f32 %v682_v9, %v613_v53  ;;  %v309_v57 = vld [vmem:[%s1573_s16 + $0x4c] sm:$0xf]  ;;  %v952_v11 = vpop.permute.xlu2 %951 }
  0xe4   : > { %v2197_v37 = vadd.f32 %v681_v48, %v612_v4  ;;  %v413_v44 = vmul.f32 %v1804_v36, %v376_v46  ;;  %v482_v59 = vmul.f32 %v1878_v18, %v445_v17  ;;  %v2202_v45 = vsel %vm779_vm0, %v905_v10, 0.0 }
  0xe5   : > { %v627_v32 = vadd.f32 %v595_v51, %v526_v49  ;;  %v515_v56 = vadd.f32 %v483_v55, %v414_v2  ;;  %v647_v5 = vperm.slane %v307_v0, 3  ;;  %v2208_v25 = vmul.f32 %v834_v20, %v2195_v40  ;;  %v2231_v51 = vpop.permute.xlu1 %877 }
  0xe6   : > { %v842_v7 = vmul.f32 %v829_v14, %v2197_v37  ;;  %v514_v35 = vadd.f32 %v482_v59, %v413_v44  ;;  %v583_v24 = vmul.f32 %v1798_v22, %v546_v60  ;;  %v2214_v53 = vadd.f32 %v2040_v54, %v852_v41  ;;  %v315_v41 = vld [vmem:[%s1573_s16 + $0x64] sm:$0xf] }
  0xe7   : > { %v696_v9 = vmul.f32 %v1862_v50, %v659_v6  ;;  %v584_v4 = vmul.f32 %v1798_v22, %v547_v28  ;;  %v648_v0 = vperm.slane %v2168_v43, 3  ;;  %v684_v20 = vmul.f32 %v1862_v50, %v647_v5 }
  0xe8   : > { %v615_v10 = vadd.f32 %v583_v24, %v514_v35  ;;  %v390_v14 = vperm.slane %v2205_v12, 0  ;;  %v459_v48 = vperm.slane %v2205_v12, 1  ;;  %v378_v46 = vperm.slane %v309_v57, 0 }
  0xe9   : > { %v2222_v49 = vadd.f32 %v696_v9, %v627_v32  ;;  %v616_v55 = vadd.f32 %v584_v4, %v515_v56  ;;  %v447_v54 = vperm.slane %v309_v57, 1  ;;  %v2226_v6 = vsel %vm779_vm0, %v842_v7, 0.0  ;;  %v932_v32 = vpop.permute.xlu0 %931 }
  0xea   : > { %v2228_v17 = vadd.f32 %v684_v20, %v615_v10  ;;  %v560_v43 = vperm.slane %v2205_v12, 2  ;;  %v548_v2 = vperm.slane %v309_v57, 2  ;;  %v685_v60 = vmul.f32 %v1862_v50, %v648_v0  ;;  %v317_v10 = vld [vmem:[%s1573_s16 + $0x6c] sm:$0xf] }
  0xeb   : > { %2575 = vst [vmem:[#allocation16_spill] sm:$0xff] %v2222_v49  ;;  %v2234_v28 = vmul.f32 %v952_v11, %v2222_v49  ;;  %v415_v44 = vmul.f32 %v1804_v36, %v378_v46  ;;  %v484_v59 = vmul.f32 %v1878_v18, %v447_v54  ;;  %v427_v5 = vmul.f32 %v1804_v36, %v390_v14 }
  0xec   : > { %v901_v56 = vmul.f32 %v868_v1, %v2228_v17  ;;  %v496_v7 = vmul.f32 %v1878_v18, %v459_v48  ;;  %v384_v35 = vperm.slane %v315_v41, 0  ;;  %v2242_v24 = vadd.f32 %v685_v60, %v616_v55 }
  0xed   : > { %v516_v9 = vadd.f32 %v484_v59, %v415_v44  ;;  %v453_v4 = vperm.slane %v315_v41, 1  ;;  %v554_v11 = vperm.slane %v315_v41, 2  ;;  %v597_v0 = vmul.f32 %v1798_v22, %v560_v43 }
  0xee   : > { %v585_v46 = vmul.f32 %v1798_v22, %v548_v2  ;;  %v649_v54 = vperm.slane %v309_v57, 3  ;;  %v909_v1 = vsel %vm779_vm0, %v901_v56, 0.0  ;;  %v421_v14 = vmul.f32 %v1804_v36, %v384_v35  ;;  %v942_v35 = vpop.permute.xlu1 %941 }
  0xef   : > { %v490_v48 = vmul.f32 %v1878_v18, %v453_v4  ;;  %v655_v55 = vperm.slane %v315_v41, 3  ;;  %v902_v60 = vmul.f32 %v2189_v39, %v2242_v24  ;;  %v528_v44 = vadd.f32 %v496_v7, %v427_v5 }
  0xf0   : > { %v386_v59 = vperm.slane %v317_v10, 0  ;;  %v455_v49 = vperm.slane %v317_v10, 1  ;;  %v617_v43 = vadd.f32 %v585_v46, %v516_v9  ;;  %v591_v20 = vmul.f32 %v1798_v22, %v554_v11 }
  0xf1   : > { %v522_v16 = vadd.f32 %v490_v48, %v421_v14  ;;  %v556_v57 = vperm.slane %v317_v10, 2  ;;  %v910_v2 = vadd.f32 %v909_v1, %v2073_v34  ;;  %v686_v56 = vmul.f32 %v1862_v50, %v649_v54  ;;  %v883_v14 = vpop.permute.xlu0 %882  ;;  %v312_v1 = vld [vmem:[%s1573_s16 + $0x58] sm:$0xf] }
  0xf2   : > { %v423_v41 = vmul.f32 %v1804_v36, %v386_v59  ;;  %v492_v4 = vmul.f32 %v1878_v18, %v455_v49  ;;  %v692_v5 = vmul.f32 %v1862_v50, %v655_v55  ;;  %v657_v7 = vperm.slane %v317_v10, 3 }
  0xf3   : > { %v623_v39 = vadd.f32 %v591_v20, %v522_v16  ;;  %v379_v9 = vperm.slane %v310_v42, 0  ;;  %v593_v11 = vmul.f32 %v1798_v22, %v556_v57  ;;  %v448_v48 = vperm.slane %v310_v42, 1  ;;  %v318_v57 = vld [vmem:[%s1573_s16 + $0x70] sm:$0xf] }
  0xf4   : > { %v524_v46 = vadd.f32 %v492_v4, %v423_v41  ;;  %v549_v34 = vperm.slane %v310_v42, 2  ;;  %v911_v54 = vsel %vm779_vm0, %v902_v60, 0.0  ;;  %v2263_v26 = vadd.f32 %v597_v0, %v528_v44 }
  0xf5   : > { %v2265_v59 = vadd.f32 %v686_v56, %v617_v43  ;;  %v2267_v16 = vadd.f32 %v692_v5, %v623_v39  ;;  %v2269_v49 = vadd.f32 %v911_v54, %v910_v2  ;;  %v416_v20 = vmul.f32 %v1804_v36, %v379_v9 }
  0xf6   : > { %v625_v10 = vadd.f32 %v593_v11, %v524_v46  ;;  %v485_v55 = vmul.f32 %v1878_v18, %v448_v48  ;;  %v650_v4 = vperm.slane %v310_v42, 3  ;;  %v381_v0 = vperm.slane %v312_v1, 0 }
  0xf7   : > { %2576 = vst [vmem:[#allocation17_spill] sm:$0xff] %v2265_v59  ;;  %v965_v41 = vmul.f32 %v932_v32, %v2267_v16  ;;  %v450_v60 = vperm.slane %v312_v1, 1  ;;  %v694_v44 = vmul.f32 %v1862_v50, %v657_v7  ;;  %v586_v2 = vmul.f32 %v1798_v22, %v549_v34  ;;  %v320_v7 = vld [vmem:[%s1573_s16 + $0x78] sm:$0xf] }
  0xf8   : > { %2577 = vst [vmem:[#allocation18_spill] sm:$0xff] %v2267_v16  ;;  %v517_v43 = vadd.f32 %v485_v55, %v416_v20  ;;  %v551_v56 = vperm.slane %v312_v1, 2  ;;  %v418_v5 = vmul.f32 %v1804_v36, %v381_v0  ;;  %v387_v46 = vperm.slane %v318_v57, 0  ;;  %v893_v20 = vpop.permute.xlu1 %892 }
  0xf9   : > { %v973_v39 = vsel %vm779_vm0, %v965_v41, 0.0  ;;  %v487_v9 = vmul.f32 %v1878_v18, %v450_v60  ;;  %v903_v42 = vmul.f32 %v2231_v51, %v2265_v59  ;;  %v2284_v32 = vadd.f32 %v694_v44, %v625_v10 }
  0xfa   : > { %v618_v11 = vadd.f32 %v586_v2, %v517_v43  ;;  %v652_v48 = vperm.slane %v312_v1, 3  ;;  %v974_v34 = vadd.f32 %v973_v39, %v2164_v58  ;;  %v687_v54 = vmul.f32 %v1862_v50, %v650_v4 }
  0xfb   : > { %2578 = vst [vmem:[#allocation19_spill] sm:$0xff] %v2284_v32  ;;  %v519_v55 = vadd.f32 %v487_v9, %v418_v5  ;;  %v456_v41 = vperm.slane %v318_v57, 1  ;;  %v967_v51 = vmul.f32 %v942_v35, %v2284_v32  ;;  %v588_v10 = vmul.f32 %v1798_v22, %v551_v56  ;;  %v947_v5 = vpop.permute.xlu0 %946  ;;  %v313_v9 = vld [vmem:[%s1573_s16 + $0x5c] sm:$0xf]  ;;  %s288_s16 = sadd.s32 %s1212_s8, %s286_s17 }
  0xfc   : > { %v424_v1 = vmul.f32 %v1804_v36, %v387_v46  ;;  %v557_v0 = vperm.slane %v318_v57, 2  ;;  %v2297_v60 = vadd.f32 %v687_v54, %v618_v11  ;;  %v658_v43 = vperm.slane %v318_v57, 3  ;;  %s289_s6 = scalar_lea.vmem %s2507_s4, %s288_s16  ;;  %s1360_s16 = scalar_lea.hbm %s2508_s5, 512 }
  0xfd   : > { %v493_v44 = vmul.f32 %v1878_v18, %v456_v41  ;;  %v389_v58 = vperm.slane %v320_v7, 0  ;;  %v913_v4 = vsel %vm779_vm0, %v903_v42, 0.0  ;;  %v620_v2 = vadd.f32 %v588_v10, %v519_v55  ;;  %p1362_p11 = scmp.lt.s32.totalorder %s1360_s16, %s1356_s14 }
  0xfe   : > { %v689_v39 = vmul.f32 %v1862_v50, %v652_v48  ;;  %v458_v35 = vperm.slane %v320_v7, 1  ;;  %v976_v56 = vadd.f32 %v2173_v52, %v974_v34  ;;  %v904_v46 = vmul.f32 %v883_v14, %v2297_v60 }
  0xff   : > { %v525_v11 = vadd.f32 %v493_v44, %v424_v1  ;;  %v594_v54 = vmul.f32 %v1798_v22, %v557_v0  ;;  %v426_v57 = vmul.f32 %v1804_v36, %v389_v58  ;;  %v559_v32 = vperm.slane %v320_v7, 2  ;;  %p1363_p13 = por %p1362_p11, %p1361_p10 }
 0x100   : > { %v495_v41 = vmul.f32 %v1878_v18, %v458_v35  ;;  %v660_v42 = vperm.slane %v320_v7, 3  ;;  %v977_v55 = vsel %vm779_vm0, %v967_v51, 0.0  ;;  %v695_v10 = vmul.f32 %v1862_v50, %v658_v43 }
 0x101   : > { %v626_v48 = vadd.f32 %v594_v54, %v525_v11  ;;  %v382_v16 = vperm.slane %v313_v9, 0  ;;  %v2314_v59 = vadd.f32 %v689_v39, %v620_v2  ;;  %v596_v14 = vmul.f32 %v1798_v22, %v559_v32  ;;  %p1364_p0 = pnand %p1363_p13, %p1359_p8 }
 0x102   : > { %v527_v52 = vadd.f32 %v495_v41, %v426_v57  ;;  %v451_v34 = vperm.slane %v313_v9, 1  ;;  %v915_v1 = vsel %vm779_vm0, %v904_v46, 0.0  ;;  %v697_v44 = vmul.f32 %v1862_v50, %v660_v42 }
 0x103   : > { %v2318_v0 = vadd.f32 %v695_v10, %v626_v48  ;;  %v419_v7 = vmul.f32 %v1804_v36, %v382_v16  ;;  %v552_v43 = vperm.slane %v313_v9, 2  ;;  %v653_v35 = vperm.slane %v313_v9, 3  ;;  %v957_v36 = vpop.permute.xlu1 %956  ;;  %v962_v16 = vpop.permute.xlu2 %961 }
 0x104   : > { %v628_v51 = vadd.f32 %v596_v14, %v527_v52  ;;  %v488_v58 = vmul.f32 %v1878_v18, %v451_v34  ;;  %v2579_v32 = vperm.slane %v2205_v12, 3  ;;  %v914_v39 = vadd.f32 %v913_v4, %v2269_v49  ;;  %v898_v48 = vpop.permute.xlu0 %897 }
 0x105   : > { %v906_v46 = vmul.f32 %v893_v20, %v2314_v59  ;;  %v968_v11 = vmul.f32 %v947_v5, %v2318_v0  ;;  %v978_v54 = vadd.f32 %v977_v55, %v976_v56  ;;  %v589_v57 = vmul.f32 %v1798_v22, %v552_v43  ;;  %v994_v20 = vld [vmem:[%s289_s6] sm:$0x1] }
 0x106   : > { %v698_v2 = vmul.f32 %v1862_v50, %v2579_v32  ;;  %v2332_v18 = vadd.f32 %v697_v44, %v628_v51  ;;  %v520_v9 = vadd.f32 %v488_v58, %v419_v7  ;;  %v856_v41 = vadd.f32 %v2226_v6, %v2214_v53 }
 0x107   : > { %v916_v42 = vadd.f32 %v915_v1, %v914_v39  ;;  %v979_v49 = vsel %vm779_vm0, %v968_v11, 0.0  ;;  %v690_v55 = vmul.f32 %v1862_v50, %v653_v35  ;;  %v857_v22 = vsel %vm779_vm0, %v2208_v25, 0.0 }
 0x108   : > { %v2338_v12 = vadd.f32 %v698_v2, %v2263_v26  ;;  %v980_v4 = vadd.f32 %v979_v49, %v978_v54  ;;  %v970_v5 = vmul.f32 %v957_v36, %v2332_v18  ;;  %v621_v56 = vadd.f32 %v589_v57, %v520_v9 }
 0x109   : > { %v981_v53 = vsel %vm779_vm0, %v2234_v28, 0.0  ;;  %v919_v6 = vsel %vm779_vm0, %v906_v46, 0.0  ;;  %vm995_vm1 = vcmp.gt.f32.partialorder %v994_v20, 0.0  ;;  %v858_v34 = vadd.f32 %v857_v22, %v856_v41 }
 0x10a   : > { %v971_v26 = vmul.f32 %v962_v16, %v2338_v12  ;;  %v982_v10 = vadd.f32 %v981_v53, %v980_v4  ;;  %v983_v52 = vsel %vm779_vm0, %v970_v5, 0.0  ;;  %v722_v14 = vadd.f32 %v690_v55, %v621_v56 }
 0x10b   : > { %v918_v1 = vadd.f32 %v2202_v45, %v916_v42  ;;  %v793_v50 = vsel %vm779_vm0, %v2105_v61, 0.0  ;;  %v2580_v51 = vmov 0  }
 0x10c   : > { %v984_v44 = vadd.f32 %v983_v52, %v982_v10  ;;  %v907_v25 = vmul.f32 %v898_v48, %v722_v14  ;;  %v794_v7 = vadd.f32 %v793_v50, %v2122_v23  ;;  %v996_v58 = vsel %vm995_vm1, 1, %v2580_v51  ;;  %v991_v45 = vpop.permute.xlu0 %990  ;;  %v2587_v51 = vld [vmem:[#allocation16_spill] sm:$0xff] }
 0x10d   : > { %v920_v28 = vadd.f32 %v919_v6, %v918_v1  ;;  %v985_v43 = vsel %vm779_vm0, %v971_v26, 0.0  ;;  %v997_v46 = vperm.slane %v996_v58, 0 }
 0x10e   : > { %v921_v35 = vsel %vm779_vm0, %v907_v25, 0.0  ;;  %v859_v2 = vadd.f32 %v858_v34, %v794_v7  ;;  %v986_v39 = vadd.f32 %v985_v43, %v984_v44  ;;  %v2585_v44 = vld [vmem:[#allocation13_spill] sm:$0xff]  ;;  %v2586_v7 = vld [vmem:[#allocation19_spill] sm:$0xff] }
 0x10f   : > { %v922_v32 = vadd.f32 %v921_v35, %v920_v28  ;;  %vm998_vm2 = vcmp.eq.s32.totalorder %v997_v46, 1 }
 0x111   : > { %v923_v11 = vadd.f32 %v922_v32, %v859_v2 }
 0x113   : > { %v987_v36 = vadd.f32 %v986_v39, %v923_v11 }
 0x115   : > { %v993_v61 = vadd.f32 %v991_v45, %v987_v36 }
 0x117   : > { %v999_v16 = vsel %vm998_vm2, %v993_v61, -30.0 }
 0x118   : > { %v1000_v54 = vsub.f32 0.0, %v999_v16 }
 0x11a   : > { %v1001_v9 = vmul.f32 1.442695, %v1000_v54 }
 0x11c   : > { %1306 = vpow2.f32 %v1001_v9 }
 0x122   : > { %v1307_v23 = vpop.eup %1306 }
 0x123   : > { %v1003_v57 = vadd.f32 1.0, %v1307_v23 }
 0x125   : > { %1308 = vrcp.f32 %v1003_v57  ;;  %v1015_v20 = vand.u32 2147483648, %v1003_v57  ;;  %v1013_v5 = vand.u32 2147483647, %v1003_v57  ;;  %vm1009_vm4 = vweird.f32 %v1003_v57 }
 0x127   : > { %v1016_v56 = vor.u32 1.1754944e-38, %v1015_v20  ;;  %vm1014_vm6 = vcmp.eq.f32.partialorder %v1013_v5, 8.507059e+37 }
 0x12b   : > { %v1309_v41 = vpop.eup %1308 }
 0x12c   : > { %v1005_v42 = vmul.f32 %v1309_v41, %v1003_v57  ;;  %vm1010_vm3 = vweird.f32 %v1309_v41 }
 0x12d   : > { %vm1011_vm5 = vmor %vm1009_vm4, %vm1010_vm3 }
 0x12e   : > { %v1006_v49 = vsub.f32 1.0, %v1005_v42 }
 0x130   : > { %v1007_v4 = vmul.f32 %v1309_v41, %v1006_v49 }
 0x132   : > { %v1008_v48 = vadd.f32 %v1309_v41, %v1007_v4 }
 0x134   : > { %v1012_v55 = vsel %vm1011_vm5, %v1309_v41, %v1008_v48 }
 0x135   : > { %v2357_v22 = vsel %vm1014_vm6, %v1016_v56, %v1012_v55 }
 0x136   : > { %v1018_v53 = vmul.f32 %v2357_v22, %v1940_v3  ;;  %v1019_v26 = vmul.f32 %v2357_v22, %v1942_v15  ;;  %v1020_v6 = vmul.f32 %v2357_v22, %v1958_v33  ;;  %v1021_v10 = vmul.f32 %v2357_v22, %v1972_v30 }
 0x137   : > { %v1022_v52 = vmul.f32 %v2357_v22, %v2005_v27  ;;  %v1026_v34 = vmul.f32 %v2357_v22, %v2089_v19  ;;  %v1028_v1 = vmul.f32 %v2357_v22, %v2128_v31  ;;  %v1029_v3 = vmul.f32 %v2357_v22, %v2131_v62 }
 0x138   : > { %1050 = vst [vmem:[%s2377_s10] sm:$0xf] %v1018_v53  ;;  %v1023_v15 = vmul.f32 %v2357_v22, %v2045_v38  ;;  %v1024_v33 = vmul.f32 %v2357_v22, %v2043_v21  ;;  %v1025_v30 = vmul.f32 %v2357_v22, %v2075_v47  ;;  %v1038_v27 = vmul.f32 %v2357_v22, %v2297_v60 }
 0x139   : > { %1051 = vst [vmem:[%s2377_s10 + $0x4] sm:$0xf] %v1019_v26  ;;  %v1040_v19 = vmul.f32 %v2357_v22, %v2314_v59  ;;  %v1041_v31 = vmul.f32 %v2357_v22, %v722_v14  ;;  %v1027_v21 = vmul.f32 %v2357_v22, %v2086_v8  ;;  %v1046_v38 = vmul.f32 %v2357_v22, %v2318_v0  ;;  %v2581_v0 = vld [vmem:[#allocation17_spill] sm:$0xff]  ;;  %v2584_v14 = vld [vmem:[#allocation18_spill] sm:$0xff] }
 0x13a   : > { %1052 = vst [vmem:[%s2377_s10 + $0x8] sm:$0xf] %v1020_v6  ;;  %v1048_v47 = vmul.f32 %v2357_v22, %v2332_v18  ;;  %v1030_v62 = vmul.f32 %v2357_v22, %v2142_v13  ;;  %v1031_v8 = vmul.f32 %v2357_v22, %v1970_v29  ;;  %v1032_v59 = vmul.f32 %v2357_v22, %v2197_v37 }
 0x13b   : > { %1053 = vst [vmem:[%s2377_s10 + $0xc] sm:$0xf] %v1021_v10  ;;  %v1033_v60 = vmul.f32 %v2357_v22, %v2195_v40  ;;  %v1034_v13 = vmul.f32 %v2357_v22, %v2019_v63  ;;  %v1035_v29 = vmul.f32 %v2357_v22, %v2228_v17  ;;  %v1036_v37 = vmul.f32 %v2357_v22, %v2242_v24  ;;  %v2582_v63 = vld [vmem:[#allocation14_spill] sm:$0xff]  ;;  %v2583_v17 = vld [vmem:[#allocation15_spill] sm:$0xff] }
 0x13c   : > { %1054 = vst [vmem:[%s2377_s10 + $0x10] sm:$0xf] %v1022_v52  ;;  %v1037_v40 = vmul.f32 %v2357_v22, %v2581_v0  ;;  %v1039_v18 = vmul.f32 %v2357_v22, %v2582_v63  ;;  %v1042_v24 = vmul.f32 %v2357_v22, %v2583_v17  ;;  %v1043_v50 = vmul.f32 %v2357_v22, %v2584_v14 }
 0x13d   : > { %1055 = vst [vmem:[%s2377_s10 + $0x14] sm:$0xf] %v1023_v15  ;;  %v1044_v25 = vmul.f32 %v2357_v22, %v2585_v44  ;;  %v1045_v28 = vmul.f32 %v2357_v22, %v2586_v7  ;;  %v1047_v58 = vmul.f32 %v2357_v22, %v2587_v51  ;;  %v1049_v43 = vmul.f32 %v2357_v22, %v2338_v12 }
 0x13e   : > { %1056 = vst [vmem:[%s2377_s10 + $0x18] sm:$0xf] %v1024_v33 }
 0x13f   : > { %1057 = vst [vmem:[%s2377_s10 + $0x1c] sm:$0xf] %v1025_v30 }
 0x140   : > { %1058 = vst [vmem:[%s2377_s10 + $0x20] sm:$0xf] %v1026_v34 }
 0x141   : > { %1059 = vst [vmem:[%s2377_s10 + $0x24] sm:$0xf] %v1027_v21 }
 0x142   : > { %1060 = vst [vmem:[%s2377_s10 + $0x28] sm:$0xf] %v1028_v1 }
 0x143   : > { %1061 = vst [vmem:[%s2377_s10 + $0x2c] sm:$0xf] %v1029_v3 }
 0x144   : > { %1062 = vst [vmem:[%s2377_s10 + $0x30] sm:$0xf] %v1030_v62 }
 0x145   : > { %1063 = vst [vmem:[%s2377_s10 + $0x34] sm:$0xf] %v1031_v8 }
 0x146   : > { %1064 = vst [vmem:[%s2377_s10 + $0x38] sm:$0xf] %v1032_v59 }
 0x147   : > { %1065 = vst [vmem:[%s2377_s10 + $0x3c] sm:$0xf] %v1033_v60 }
 0x148   : > { %1066 = vst [vmem:[%s2377_s10 + $0x40] sm:$0xf] %v1034_v13 }
 0x149   : > { %1067 = vst [vmem:[%s2377_s10 + $0x44] sm:$0xf] %v1035_v29 }
 0x14a   : > { %1068 = vst [vmem:[%s2377_s10 + $0x48] sm:$0xf] %v1036_v37 }
 0x14b   : > { %1069 = vst [vmem:[%s2377_s10 + $0x4c] sm:$0xf] %v1037_v40 }
 0x14c   : > { %1070 = vst [vmem:[%s2377_s10 + $0x50] sm:$0xf] %v1038_v27 }
 0x14d   : > { %1071 = vst [vmem:[%s2377_s10 + $0x54] sm:$0xf] %v1039_v18 }
 0x14e   : > { %1072 = vst [vmem:[%s2377_s10 + $0x58] sm:$0xf] %v1040_v19 }
 0x14f   : > { %1073 = vst [vmem:[%s2377_s10 + $0x5c] sm:$0xf] %v1041_v31 }
 0x150   : > { %1074 = vst [vmem:[%s2377_s10 + $0x60] sm:$0xf] %v1042_v24 }
 0x151   : > { %1075 = vst [vmem:[%s2377_s10 + $0x64] sm:$0xf] %v1043_v50 }
 0x152   : > { %1076 = vst [vmem:[%s2377_s10 + $0x68] sm:$0xf] %v1044_v25 }
 0x153   : > { %1077 = vst [vmem:[%s2377_s10 + $0x6c] sm:$0xf] %v1045_v28 }
 0x154   : > { %1078 = vst [vmem:[%s2377_s10 + $0x70] sm:$0xf] %v1046_v38 }
 0x155   : > { %1079 = vst [vmem:[%s2377_s10 + $0x74] sm:$0xf] %v1047_v58 }
 0x156   : > { %1080 = vst [vmem:[%s2377_s10 + $0x78] sm:$0xf] %v1048_v47 }
 0x157   : > { %1081 = vst [vmem:[%s2377_s10 + $0x7c] sm:$0xf] %v1049_v43 }
 0x158   : > { %1367 = shalt.err (!%p1364_p0)
}
 0x159   : > { %s1444_s15 = smov 64   ;;  %s1445_s6 = smov 128  }
 0x15a   : > { %s1446_s10 = smov 4  }
 0x15b   : > { %1220 = dma.vmem_to_hbm [thread:$0]  (%p1542_p9), %s1097_s20, 2048, %s1099_s28, %s1083_s12, %s1444_s15, %s1445_s6, %s1446_s10  }
 0x15c PF: > { %p1231_p1 = scmp.ge.s32.totalorder %s1438_s25, 2  ;;  %s1113_s11 = sand.u32 1, %s1410_s18  }
 0x15d   : > { %s1114_s22 = scalar_lea.sflag [#allocation4], %s1113_s11 }
 0x15e   : > { %p1227_p2 = pnand %p1231_p1, %p1548_p12 }
 0x160   : > { %p1228_p4 = pneg %p1227_p2 }
 0x162   : > { %1405 = dma.done.wait (%p1228_p4), %s1114_s22, 2048  }
 0x163   : > { %1407 = vsyncadd (%p1228_p4), %s1114_s22, 4294965248  ;;  %s21_s25 = sadd.s32 1, %s1438_s25   ;;  %s2589_s21 = sld [smem:[#allocation8_spill]] }
 0x164   : > { %p18_p3 = scmp.ge.s32.totalorder %s21_s25, 6   ;;  %s2590_s20 = sld [smem:[#allocation12_spill]] }
 0x165   : > { %s2591_s9 = sld [smem:[#allocation9_spill]]  ;;  %s2593_s18 = smov %s1414_s19 }
 0x166   : > { %s2592_s30 = sld [smem:[#allocation10_spill]]  ;;  %s2596_s22 = smov %s1434_s24 }
 0x168   :  { %20 = sbr.rel (!%p18_p3) target bundleno = 7 (0x7), region = 88 }
 0x169   : > { %s2594_s19 = smov %s2589_s21  ;;  %s2595_s21 = smov %s1430_s23 }
 0x16b   : > { %s2597_s23 = smov %s2591_s9 }
 0x16c   : > { %s2598_s24 = smov %s2592_s30 }
 0x16d   :  { %1120 = vsyncpa [#allocation3], 1 }
 0x16e   :  { %1122 = vsyncpa [#allocation3 + $0x1], 1 }
 0x16f   :  { %1123 = vsyncpa [#allocation4], 1 }
 0x170   :  { %1125 = vsyncpa [#allocation4 + $0x1], 1 }

</bundles_post_ra>
